<compile_context>
chip_gen: v7x
topology: tpu7x:2x2x1
jax: 0.10.0
libtpu: 0.0.40
codegen_flags: <defaults>
</compile_context>

<pallas_src>
import functools

import jax
import jax.numpy as jnp
import numpy as np
from jax.experimental import pallas as pl
from jax.experimental.pallas import tpu as pltpu

_NROW = 8  # sublane-padded number of qa output rows (num_labels=2 -> padded to 8)


def _qa_sc_kernel(pq_ref,       # SMEM (B, 2) int32 scalar-prefetch: [q_end, p_end]
                  seq_ref,      # VMEM (1, tS, H)    bf16 sequence_output tile
                  ques_ref,     # VMEM (1, Qpad, H)  bf16 pre-sliced, pre-masked, zero-padded question
                  map_wT_ref,   # VMEM (H, H)        bf16 map_linear weight, [in, out]
                  map_b_ref,    # VMEM (1, H)        f32  map_linear bias
                  qa_w8_ref,    # VMEM (8, H)        bf16 qa_outputs weight rows, zero-padded to 8
                  qa_b8_ref,    # VMEM (8, 1)        f32  qa_outputs bias, zero-padded to 8
                  out_ref,      # VMEM (1, 8, tS)    f32  transposed logits tile (lane-dense on S)
                  *, ques_valid_len):
    b = pl.program_id(0)
    Qpad = ques_ref.shape[1]

    seq_bf = seq_ref[0]                            # (tS, H) bf16
    ques = ques_ref[0]                             # (Qpad, H) bf16, rows >= qlen are exactly zero

    # Question-length mask over the (padded) Q axis, recomputed from scalar prefetch.
    qlen = jnp.minimum(pq_ref[b, 0], ques_valid_len)
    qmask_row = (jax.lax.broadcasted_iota(jnp.int32, (1, Qpad), 1) < qlen).astype(jnp.float32)

    # scores = passage @ question^T -> (tS, Qpad). bf16 MXU inputs, f32 accumulation.
    # Masked / padded question rows are exactly zero, so masked columns of `scores` are 0.
    scores = jax.lax.dot_general(
        seq_bf, ques,
        dimension_numbers=(((1,), (1,)), ((), ())),
        preferred_element_type=jnp.float32)

    # masked_softmax, single-normalization form: softmax(scores*mask)*mask renormalized is
    # identical (up to the 1e-13 eps scale) to exp(s - m)*mask / (sum(exp(s - m)*mask) + eps),
    # because the initial softmax normalization cancels in the renorm.
    m = jnp.max(scores, axis=-1, keepdims=True)
    p = jnp.exp(scores - m) * qmask_row
    p = p * pl.reciprocal(jnp.sum(p, axis=-1, keepdims=True) + 1e-13, approx=True)

    # context = alpha @ question -> (tS, H)
    attn = jnp.dot(p.astype(jnp.bfloat16), ques, preferred_element_type=jnp.float32)

    # ReLU(map_linear(context))
    attn = jnp.maximum(
        jnp.dot(attn.astype(jnp.bfloat16), map_wT_ref[...],
                preferred_element_type=jnp.float32) + map_b_ref[...],
        0.0)

    # residual + qa_outputs projection, computed transposed: (8, H) @ (tS, H)^T -> (8, tS).
    # The tS axis is the lane axis of the store, so the writeback is lane-dense.
    seq2 = (attn + seq_bf.astype(jnp.float32)).astype(jnp.bfloat16)
    logits_t = jax.lax.dot_general(
        qa_w8_ref[...], seq2,
        dimension_numbers=(((1,), (1,)), ((), ())),
        preferred_element_type=jnp.float32) + qa_b8_ref[...]

    out_ref[0] = logits_t.astype(out_ref.dtype)


def _const_spec(shape, index_map):
    """Single-buffered BlockSpec for grid-invariant blocks (double-buffering them only doubles
    their resident VMEM footprint). Falls back to the default if pipeline_mode is unsupported."""
    try:
        return pl.BlockSpec(shape, index_map, pipeline_mode=pl.Buffered(1))
    except (TypeError, AttributeError):
        return pl.BlockSpec(shape, index_map)


def _pick_s_tile(S, B):
    # Largest common tile that divides S (384 is the common XLM-R max_seq_length).
    candidates = (512, 384, 256, 128)
    tS = next((t for t in candidates if S % t == 0), S)
    # v7x has 2 TensorCores: with B == 1 make sure the grid exposes >= 2 parallel points.
    if B == 1 and S // tS < 2:
        for t in (S // 2,) + candidates:
            if t >= 8 and t % 8 == 0 and S % t == 0 and S // t >= 2:
                tS = t
                break
    return tS


def qa_sc_forward(sequence_output, pq_end_pos, map_wT, map_b, qa_wT, qa_b, *, ques_max_len):
    """Returns (start_logits, end_logits), each of shape (B, S)."""
    B, S, H = sequence_output.shape
    num_labels = qa_wT.shape[1]
    Q = ques_max_len

    # ---- wrapper-side glue (split_ques_context query branch + layout plumbing) ----
    # Slice rows [1, 1+Q) (static slice clamps at S), apply the length mask, zero-pad the Q axis
    # to a multiple of 128 (exactly 128 unless Q > 128 -- do NOT over-pad) and cast to bf16.
    Qpad = max(128, ((Q + 127) // 128) * 128)
    q_take = min(Q, max(S - 1, 0))
    qlen = jnp.minimum(pq_end_pos[:, 0].astype(jnp.int32), q_take)
    col_mask = (jnp.arange(q_take)[None, :] < qlen[:, None]).astype(sequence_output.dtype)
    ques = sequence_output[:, 1:1 + q_take, :] * col_mask[:, :, None]
    ques = jnp.pad(ques, ((0, 0), (0, Qpad - q_take), (0, 0))).astype(jnp.bfloat16)

    # sequence_output is the dominant HBM stream: feed it to the kernel as bf16.
    seq_bf = sequence_output.astype(jnp.bfloat16)

    # Transposed, sublane-padded qa projection params: (8, H) weight rows / (8, 1) bias.
    qa_w8 = jnp.pad(qa_wT.T.astype(jnp.bfloat16), ((0, _NROW - num_labels), (0, 0)))
    qa_b8 = jnp.pad(qa_b.reshape(num_labels, 1).astype(jnp.float32),
                    ((0, _NROW - num_labels), (0, 0)))
    map_wT_bf = map_wT.astype(jnp.bfloat16)
    map_b_f32 = map_b.reshape(1, H).astype(jnp.float32)
    pq = pq_end_pos.astype(jnp.int32)

    tS = _pick_s_tile(S, B)
    nS = S // tS

    # Honest VMEM estimate: double-buffered streaming tiles + single-buffered weights +
    # in-kernel f32/bf16 temporaries (scores, p, attn, seq2, logits_t).
    tmp_bytes = (tS * Qpad * (4 + 4 + 2)               # scores, p (f32), p (bf16)
                 + tS * H * (4 + 2 + 4 + 2)            # attn f32/bf16, seq2 f32/bf16
                 + _NROW * tS * 4 + tS * 4)            # logits_t, row max/sum
    dbuf_bytes = 2 * tS * H * 2 + 2 * Qpad * H * 2 + 2 * _NROW * tS * 4
    weight_bytes = H * H * 2 + H * 4 + _NROW * H * 2 + _NROW * 4
    est = dbuf_bytes + weight_bytes + tmp_bytes
    try:
        phys_vmem = pltpu.get_tpu_info().vmem_capacity_bytes
    except Exception:
        phys_vmem = 64 * 1024 * 1024                   # conservative (v7x-sized) fallback
    cap = max(16 * 1024 * 1024, phys_vmem - 16 * 1024 * 1024)  # leave compiler-scratch headroom
    vmem_limit = int(min(cap, max(32 * 1024 * 1024, (3 * est) // 2)))

    grid_spec = pltpu.PrefetchScalarGridSpec(
        num_scalar_prefetch=1,
        grid=(B, nS),
        in_specs=[
            pl.BlockSpec((1, tS, H),   lambda b, s, pq_smem: (b, s, 0)),
            pl.BlockSpec((1, Qpad, H), lambda b, s, pq_smem: (b, 0, 0)),
            _const_spec((H, H),        lambda b, s, pq_smem: (0, 0)),
            _const_spec((1, H),        lambda b, s, pq_smem: (0, 0)),
            _const_spec((_NROW, H),    lambda b, s, pq_smem: (0, 0)),
            _const_spec((_NROW, 1),    lambda b, s, pq_smem: (0, 0)),
        ],
        out_specs=pl.BlockSpec((1, _NROW, tS), lambda b, s, pq_smem: (b, 0, s)),
    )

    # Advisory cost hint so XLA overlaps the wrapper-side glue / final slices with the kernel.
    flops = 2 * B * S * H * (2 * Qpad + H + _NROW)
    transcendentals = B * S * Qpad
    bytes_accessed = (B * S * H * 2 + B * Qpad * H * 2 + H * H * 2 + H * 4
                      + _NROW * H * 2 + _NROW * 4 + B * _NROW * S * 4 + B * 2 * 4)
    cost = pl.CostEstimate(flops=flops, transcendentals=transcendentals,
                           bytes_accessed=bytes_accessed)

    logits_t = pl.pallas_call(
        functools.partial(_qa_sc_kernel, ques_valid_len=q_take),
        grid_spec=grid_spec,
        out_shape=jax.ShapeDtypeStruct((B, _NROW, S), jnp.float32),
        compiler_params=pltpu.CompilerParams(
            dimension_semantics=("parallel", "parallel"),
            vmem_limit_bytes=vmem_limit),
        cost_estimate=cost,
    )(pq, seq_bf, ques, map_wT_bf, map_b_f32, qa_w8, qa_b8)

    start_logits = logits_t[:, 0, :]   # squeeze(-1) of split(1, dim=-1)
    end_logits = logits_t[:, 1, :]
    return start_logits, end_logits


def qa_sc_reference(sequence_output, pq_end_pos, map_wT, map_b, qa_wT, qa_b, *, ques_max_len):
    """Pure-JAX reference mirroring the PyTorch forward semantics (sc_ques=True, no labels)."""
    B, S, H = sequence_output.shape
    Q = ques_max_len
    qlen = jnp.minimum(pq_end_pos[:, 0], Q)                      # (B,)
    idx = jnp.arange(Q)
    qmask = (idx[None, :] < qlen[:, None]).astype(jnp.float32)   # (B, Q)
    ques = sequence_output[:, 1:1 + Q, :] * qmask[:, :, None]    # (B, Q, H)

    hp = jax.lax.Precision.HIGHEST
    scores = jnp.einsum('bsh,bqh->bsq', sequence_output, ques, precision=hp)
    mask = qmask[:, None, :]
    p = jax.nn.softmax(scores * mask, axis=-1)
    p = p * mask
    p = p / (p.sum(-1, keepdims=True) + 1e-13)
    out = jnp.einsum('bsq,bqh->bsh', p, ques, precision=hp)
    out = jax.nn.relu(jnp.einsum('bsh,ho->bso', out, map_wT, precision=hp) + map_b)
    seq2 = out + sequence_output
    logits = jnp.einsum('bsh,ho->bso', seq2, qa_wT, precision=hp) + qa_b
    return logits[..., 0], logits[..., 1]


if __name__ == "__main__":
    # Small, deterministic synthetic shapes.
    B, S, H = 2, 16, 32          # batch, max_seq_length, hidden_size
    Q = 8                        # max_query_length
    NUM_LABELS = 2

    key = jax.random.PRNGKey(0)
    k_seq, k_mw, k_mb, k_qw = jax.random.split(key, 4)

    # Backbone output (stand-in for the pretrained XLMRoberta encoder).
    sequence_output = jax.random.normal(k_seq, (B, S, H), dtype=jnp.float32)

    # pq_end_pos: [q_end, p_end] per batch element.
    pq_end_pos = jnp.array([[5, 13], [7, 15]], dtype=jnp.int32)

    # SCAttention.map_linear: deterministic synthetic init (torch default-ish scale).
    map_wT = jax.random.normal(k_mw, (H, H), dtype=jnp.float32) * np.sqrt(1.0 / H)
    map_b = jax.random.normal(k_mb, (1, H), dtype=jnp.float32) * 0.01
    # qa_outputs: xavier-ish weight, bias filled with 0.1 (as in init_weights).
    qa_wT = jax.random.normal(k_qw, (H, NUM_LABELS), dtype=jnp.float32) * np.sqrt(2.0 / (H + NUM_LABELS))
    qa_b = jnp.full((1, NUM_LABELS), 0.1, dtype=jnp.float32)

    start_logits, end_logits = qa_sc_forward(
        sequence_output, pq_end_pos, map_wT, map_b, qa_wT, qa_b, ques_max_len=Q)
    jax.block_until_ready((start_logits, end_logits))

    ref_start, ref_end = qa_sc_reference(
        sequence_output, pq_end_pos, map_wT, map_b, qa_wT, qa_b, ques_max_len=Q)
    # bf16 MXU operands / bf16 residual input + one approx reciprocal => relaxed tolerances.
    np.testing.assert_allclose(np.asarray(start_logits), np.asarray(ref_start), atol=0.15, rtol=0.05)
    np.testing.assert_allclose(np.asarray(end_logits), np.asarray(ref_end), atol=0.15, rtol=0.05)

    print("KERNEL_OK")
</pallas_src>

<mosaic_0001>
module attributes {stable_mosaic.version = 11 : i64} {
  func.func @_qa_sc_kernel(%arg0: i32, %arg1: i32, %arg2: memref<2x2xi32, #tpu.memory_space<smem>>, %arg3: memref<1x16x32xbf16, #tpu.memory_space<vmem>>, %arg4: memref<1x128x32xbf16, #tpu.memory_space<vmem>>, %arg5: memref<32x32xbf16, #tpu.memory_space<vmem>>, %arg6: memref<1x32xf32, #tpu.memory_space<vmem>>, %arg7: memref<8x32xbf16, #tpu.memory_space<vmem>>, %arg8: memref<8x1xf32, #tpu.memory_space<vmem>>, %arg9: memref<1x8x16xf32, #tpu.memory_space<vmem>>) attributes {dimension_semantics = [#tpu.dimension_semantics<parallel>, #tpu.dimension_semantics<parallel>], iteration_bounds = array<i64: 2, 1>, scalar_prefetch = 1 : i64, scratch_operands = 0 : i64, tpu.core_type = #tpu.core_type<tc>, window_params = [{transform_indices = @transform_0, window_bounds = array<i64: 1, 16, 32>}, {transform_indices = @transform_1, window_bounds = array<i64: 1, 128, 32>}, {pipeline_mode = #tpu.pipeline_mode<synchronous>, transform_indices = @transform_2, window_bounds = array<i64: 32, 32>}, {pipeline_mode = #tpu.pipeline_mode<synchronous>, transform_indices = @transform_3, window_bounds = array<i64: 1, 32>}, {pipeline_mode = #tpu.pipeline_mode<synchronous>, transform_indices = @transform_4, window_bounds = array<i64: 8, 32>}, {pipeline_mode = #tpu.pipeline_mode<synchronous>, transform_indices = @transform_5, window_bounds = array<i64: 8, 1>}, {transform_indices = @transform_6, window_bounds = array<i64: 1, 8, 16>}]} {
    %c0 = arith.constant 0 : index
    %c0_0 = arith.constant 0 : index
    %c0_1 = arith.constant 0 : index
    %0 = vector.load %arg3[%c0, %c0_0, %c0_1] : memref<1x16x32xbf16, #tpu.memory_space<vmem>>, vector<1x16x32xbf16>
    %1 = vector.shape_cast %0 : vector<1x16x32xbf16> to vector<16x32xbf16>
    %c0_2 = arith.constant 0 : index
    %c0_3 = arith.constant 0 : index
    %c0_4 = arith.constant 0 : index
    %2 = vector.load %arg4[%c0_2, %c0_3, %c0_4] : memref<1x128x32xbf16, #tpu.memory_space<vmem>>, vector<1x128x32xbf16>
    %3 = vector.shape_cast %2 : vector<1x128x32xbf16> to vector<128x32xbf16>
    %4 = arith.index_cast %arg0 : i32 to index
    %c0_5 = arith.constant 0 : index
    %5 = memref.load %arg2[%4, %c0_5] : memref<2x2xi32, #tpu.memory_space<smem>>
    %c8_i32 = arith.constant 8 : i32
    %6 = arith.minsi %5, %c8_i32 : i32
    %7 = tpu.iota {dimensions = array<i32: 1>} : vector<1x128xi32>
    %8 = vector.broadcast %6 : i32 to vector<1x128xi32>
    %9 = arith.cmpi slt, %7, %8 : vector<1x128xi32>
    %10 = arith.extui %9 : vector<1x128xi1> to vector<1x128xi32>
    %11 = arith.sitofp %10 : vector<1x128xi32> to vector<1x128xf32>
    %cst = arith.constant dense<0.000000e+00> : vector<16x128xf32>
    %12 = tpu.matmul %1, %3, %cst {dimension_numbers = #tpu.dot_dimension_numbers<[1], [1], [0], [0], [0, 0, 1, 0], [], []>} : vector<16x32xbf16>, vector<128x32xbf16>, vector<16x128xf32> -> vector<16x128xf32>
    %cst_6 = arith.constant dense<0xFF800000> : vector<16xf32>
    %13 = vector.multi_reduction <maximumf>, %12, %cst_6 [1] : vector<16x128xf32> to vector<16xf32>
    %14 = vector.shape_cast %13 : vector<16xf32> to vector<16x1xf32>
    %15 = vector.broadcast %14 : vector<16x1xf32> to vector<16x128xf32>
    %16 = arith.subf %12, %15 : vector<16x128xf32>
    %17 = math.exp %16 : vector<16x128xf32>
    %18 = vector.broadcast %11 : vector<1x128xf32> to vector<16x128xf32>
    %19 = arith.mulf %17, %18 : vector<16x128xf32>
    %cst_7 = arith.constant dense<0.000000e+00> : vector<16xf32>
    %20 = vector.multi_reduction <add>, %19, %cst_7 [1] : vector<16x128xf32> to vector<16xf32>
    %21 = vector.shape_cast %20 : vector<16xf32> to vector<16x1xf32>
    %cst_8 = arith.constant 9.99999982E-14 : f32
    %22 = vector.broadcast %cst_8 : f32 to vector<16x1xf32>
    %23 = arith.addf %21, %22 : vector<16x1xf32>
    %24 = tpu.reciprocal %23 {approx = true} : vector<16x1xf32> -> vector<16x1xf32>
    %25 = vector.broadcast %24 : vector<16x1xf32> to vector<16x128xf32>
    %26 = arith.mulf %19, %25 : vector<16x128xf32>
    %27 = arith.truncf %26 : vector<16x128xf32> to vector<16x128xbf16>
    %cst_9 = arith.constant dense<0.000000e+00> : vector<16x32xf32>
    %28 = tpu.matmul %27, %3, %cst_9 {dimension_numbers = #tpu.dot_dimension_numbers<[1], [0], [0], [1], [0, 0, 1, 1], [], []>} : vector<16x128xbf16>, vector<128x32xbf16>, vector<16x32xf32> -> vector<16x32xf32>
    %29 = arith.truncf %28 : vector<16x32xf32> to vector<16x32xbf16>
    %c0_10 = arith.constant 0 : index
    %c0_11 = arith.constant 0 : index
    %30 = vector.load %arg5[%c0_10, %c0_11] : memref<32x32xbf16, #tpu.memory_space<vmem>>, vector<32x32xbf16>
    %cst_12 = arith.constant dense<0.000000e+00> : vector<16x32xf32>
    %31 = tpu.matmul %29, %30, %cst_12 {dimension_numbers = #tpu.dot_dimension_numbers<[1], [0], [0], [1], [0, 0, 1, 1], [], []>} : vector<16x32xbf16>, vector<32x32xbf16>, vector<16x32xf32> -> vector<16x32xf32>
    %c0_13 = arith.constant 0 : index
    %c0_14 = arith.constant 0 : index
    %32 = vector.load %arg6[%c0_13, %c0_14] : memref<1x32xf32, #tpu.memory_space<vmem>>, vector<1x32xf32>
    %33 = vector.broadcast %32 : vector<1x32xf32> to vector<16x32xf32>
    %34 = arith.addf %31, %33 : vector<16x32xf32>
    %cst_15 = arith.constant 0.000000e+00 : f32
    %35 = vector.broadcast %cst_15 : f32 to vector<16x32xf32>
    %36 = arith.maximumf %34, %35 : vector<16x32xf32>
    %37 = arith.extf %1 : vector<16x32xbf16> to vector<16x32xf32>
    %38 = arith.addf %36, %37 : vector<16x32xf32>
    %39 = arith.truncf %38 : vector<16x32xf32> to vector<16x32xbf16>
    %c0_16 = arith.constant 0 : index
    %c0_17 = arith.constant 0 : index
    %40 = vector.load %arg7[%c0_16, %c0_17] : memref<8x32xbf16, #tpu.memory_space<vmem>>, vector<8x32xbf16>
    %cst_18 = arith.constant dense<0.000000e+00> : vector<8x16xf32>
    %41 = tpu.matmul %40, %39, %cst_18 {dimension_numbers = #tpu.dot_dimension_numbers<[1], [1], [0], [0], [0, 0, 1, 0], [], []>} : vector<8x32xbf16>, vector<16x32xbf16>, vector<8x16xf32> -> vector<8x16xf32>
    %c0_19 = arith.constant 0 : index
    %c0_20 = arith.constant 0 : index
    %42 = vector.load %arg8[%c0_19, %c0_20] : memref<8x1xf32, #tpu.memory_space<vmem>>, vector<8x1xf32>
    %43 = vector.broadcast %42 : vector<8x1xf32> to vector<8x16xf32>
    %44 = arith.addf %41, %43 : vector<8x16xf32>
    %c0_21 = arith.constant 0 : index
    %c0_22 = arith.constant 0 : index
    %c0_23 = arith.constant 0 : index
    %45 = vector.load %arg9[%c0_21, %c0_22, %c0_23] : memref<1x8x16xf32, #tpu.memory_space<vmem>>, vector<1x8x16xf32>
    %46 = vector.shape_cast %45 : vector<1x8x16xf32> to vector<8x16xf32>
    %47 = vector.shape_cast %44 : vector<8x16xf32> to vector<1x8x16xf32>
    tpu.vector_store %arg9[%c0_21, %c0_22, %c0_23], %47 {strides = array<i32>} : memref<1x8x16xf32, #tpu.memory_space<vmem>>, vector<1x8x16xf32>,
    return
  }
  func.func @transform_0(%arg0: i32, %arg1: i32, %arg2: memref<2x2xi32, #tpu.memory_space<smem>>) -> (i32, i32, i32) {
    %c0_i32 = arith.constant 0 : i32
    %c0_i32_0 = arith.constant 0 : i32
    return %arg0, %arg1, %c0_i32 : i32, i32, i32
  }
  func.func @transform_1(%arg0: i32, %arg1: i32, %arg2: memref<2x2xi32, #tpu.memory_space<smem>>) -> (i32, i32, i32) {
    %c0_i32 = arith.constant 0 : i32
    %c0_i32_0 = arith.constant 0 : i32
    %c0_i32_1 = arith.constant 0 : i32
    return %arg0, %c0_i32, %c0_i32_0 : i32, i32, i32
  }
  func.func @transform_2(%arg0: i32, %arg1: i32, %arg2: memref<2x2xi32, #tpu.memory_space<smem>>) -> (i32, i32) {
    %c0_i32 = arith.constant 0 : i32
    %c0_i32_0 = arith.constant 0 : i32
    %c0_i32_1 = arith.constant 0 : i32
    return %c0_i32, %c0_i32_0 : i32, i32
  }
  func.func @transform_3(%arg0: i32, %arg1: i32, %arg2: memref<2x2xi32, #tpu.memory_space<smem>>) -> (i32, i32) {
    %c0_i32 = arith.constant 0 : i32
    %c0_i32_0 = arith.constant 0 : i32
    %c0_i32_1 = arith.constant 0 : i32
    return %c0_i32, %c0_i32_0 : i32, i32
  }
  func.func @transform_4(%arg0: i32, %arg1: i32, %arg2: memref<2x2xi32, #tpu.memory_space<smem>>) -> (i32, i32) {
    %c0_i32 = arith.constant 0 : i32
    %c0_i32_0 = arith.constant 0 : i32
    %c0_i32_1 = arith.constant 0 : i32
    return %c0_i32, %c0_i32_0 : i32, i32
  }
  func.func @transform_5(%arg0: i32, %arg1: i32, %arg2: memref<2x2xi32, #tpu.memory_space<smem>>) -> (i32, i32) {
    %c0_i32 = arith.constant 0 : i32
    %c0_i32_0 = arith.constant 0 : i32
    %c0_i32_1 = arith.constant 0 : i32
    return %c0_i32, %c0_i32_0 : i32, i32
  }
  func.func @transform_6(%arg0: i32, %arg1: i32, %arg2: memref<2x2xi32, #tpu.memory_space<smem>>) -> (i32, i32, i32) {
    %c0_i32 = arith.constant 0 : i32
    %c0_i32_0 = arith.constant 0 : i32
    return %arg0, %c0_i32, %arg1 : i32, i32, i32
  }
}

</mosaic_0001>

<bundles_post_ra>
// kernel: tpu_custom_call.1
= control target key start
LH: loop header
LB: loop body
LE: loop exit
PB: predicated region body
PF: predicated region fallthrough
CT: control target
= control target key end

     0   :  { %s1278_s0 = inlined_call_operand.vmem [shape: s32[2,2], index: 0, kind: input, shape index: {}]   ;;  %s1279_s1 = inlined_call_operand.vmem [shape: bf16[2,16,32], index: 1, kind: input, shape index: {}]   ;;  %s1280_s2 = inlined_call_operand.vmem [shape: bf16[2,128,32], index: 2, kind: input, shape index: {}]   ;;  %s1281_s3 = inlined_call_operand.vmem [shape: bf16[32,32], index: 3, kind: input, shape index: {}]   ;;  %s1282_s4 = inlined_call_operand.vmem [shape: f32[1,32], index: 4, kind: input, shape index: {}]   ;;  %s1283_s5 = inlined_call_operand.vmem [shape: bf16[8,32], index: 5, kind: input, shape index: {}]   ;;  %s1284_s6 = inlined_call_operand.vmem [shape: f32[8,1], index: 6, kind: input, shape index: {}]   ;;  %s1285_s7 = inlined_call_operand.hbm [shape: f32[2,8,16], index: 7, kind: output, shape index: {}]  }
   0x1   :  { %s12_s26 = sshll.u32 %s1278_s0, 4  ;;  %s13_s26 = int_to_ptr.vmem [resolvable:$true] %s12_s26 }
   0x2   :  { %s943_s27 = scalar_lea.vmem %s13_s26, 32  ;;  %p948_p1 = scmp.lt.s32.totalorder %s13_s26, %s13_s26 }
   0x3   :  { %p944_p0 = scmp.ne.s32.totalorder %s13_s26, %s943_s27  ;;  %p949_p2 = scmp.lt.s32.totalorder %s943_s27, %s943_s27 }
   0x5   :  { %p950_p3 = por %p949_p2, %p948_p1 }
   0x7   :  { %p951_p4 = pnand %p950_p3, %p944_p0 }
   0x9   :  { %954 = shalt.err (!%p951_p4)  }
   0xa   :  { %s1037_s28 = smov [#allocation3]  }
   0xb   :  { %15 = dma.vmem_to_smem %s13_s26, 32, %s1037_s28, [#allocation2] }
   0xc   :  { %1007 = dma.done.wait [#allocation2], 32 }
   0xd   :  { %1008 = vsyncadd [#allocation2], 4294967264 }
   0xe   :  { %17 = sfence }
   0xf   :  { %18 = vsyncpa [#allocation5], 0 }
  0x10   :  { %20 = vsyncpa [#allocation5 + $0x1], 0  ;;  %s1085_s29 = smov 0   ;;  %s1087_s30 = smov 0  }
  0x11   :  { %s1089_s0 = smov 0   ;;  %s1091_s8 = smov 0  }
  0x12   :  { %s1093_s9 = smov 0   ;;  %s1095_s10 = smov 0  }
  0x13 LB: > { %s753_s11 = sadd.s32 4294967295, %s1035_s10   ;;  %s754_s12 = sadd.s32 4294967294, %s1035_s10   ;;  %s1035_s10 = sphi %s1095_s10, %s26_s10   ;;  %s1031_s9 = sphi %s1093_s9, %s1292_s9   ;;  %s1027_s8 = sphi %s1091_s8, %s1291_s8   ;;  %s1023_s0 = sphi %s1089_s0, %s1290_s0   ;;  %s1019_s30 = sphi %s1087_s30, %s1289_s30   ;;  %s1015_s29 = sphi %s1085_s29, %s1288_s29  }
  0x14   : > { %s38_s13 = sadd.s32 1, %s1031_s9  ;;  %s185_s14 = sadd.s32 1, %s1023_s0 }
  0x15   : > { %p40_p5 = scmp.ge.s32.totalorder %s38_s13, 2  ;;  %p195_p6 = scmp.ne.s32.totalorder %s1023_s0, %s1019_s30 }
  0x16   : > { %p196_p7 = scmp.eq.s32.totalorder %s753_s11, 1  ;;  %p201_p8 = scmp.ne.s32.totalorder %s1019_s30, %s1015_s29 }
  0x17   : > { %s1294_s13 = smov (%p40_p5, %s38_s13), 0  ;;  %p202_p10 = scmp.eq.s32.totalorder %s754_s12, 1 }
  0x18   : > { %p1125_p9 = por %p196_p7, %p195_p6  ;;  %s180_s16 = ssub.s32 %s1031_s9, %s1294_s13 }
  0x19   : > { %p757_p11 = scmp.ge.s32.totalorder %s1035_s10, 1  ;;  %p183_p12 = scmp.eq.s32.totalorder %s180_s16, 0 }
  0x1a   : > { %p1132_p13 = por %p202_p10, %p201_p8  ;;  %p253_p0 = scmp.lt.s32.totalorder %s1035_s10, 3 }
  0x1b   : > { %s1138_s18 = scalar_select %p183_p12, %s1023_s0, %s185_s14  }
  0x1c   : > { %p254_p1 = pnand %p757_p11, %p253_p0 }
  0x1d   : > { %p293_p2 = scmp.lt.s32.totalorder (!%p254_p1), %s1027_s8, 1  ;;  %v1038_v0 = vmov (!%p254_p1), 0.0   ;;  %vm1039_vm0 = vmmov (!%p254_p1), 0   ;;  %vm381_vm1 = vcmask (!%p254_p1), 261120   ;;  %s763_s28 = sshll.u32 (!%p254_p1), %s1027_s8, 7  ;;  %v330_v24 = vlaneseq (!%p254_p1)  ;;  %v932_v44 = vld [vmem:[%s1281_s3] sm:$0xff] (!%p254_p1)  }
  0x1e   : > { %257 = sbr.rel (%p254_p1) target bundleno = 1314 (0x522), region = 44  ;;  %809 = vmatprep.subr.bf16.mxu0 (!%p254_p1), %v1038_v0  ;;  %825 = vmatprep.mubr.msk.bf16.mxu0 (!%p254_p1), %vm1039_vm0, %v1038_v0  ;;  %s327_s11 = sld [smem:[#allocation3 + %s763_s28]] (!%p254_p1)  ;;  %v933_v46 = vld [vmem:[%s1281_s3 + $0x8] sm:$0xff] (!%p254_p1)   ;;  %v598_v52 = vld [vmem:[%s1284_s6] sm:$0xff] (!%p254_p1)  ;;  %v1040_v53 = vmov (!%p254_p1), 0   ;;  %vm650_vm3 = vcmask (!%p254_p1), 130048  }
  0x1f   : > { %829 = vmatprep.subr.bf16.mxu1 (!%p254_p1), %v1038_v0  ;;  %845 = vmatprep.mubr.msk.bf16.mxu1 (!%p254_p1), %vm1039_vm0, %v1038_v0  ;;  %v331_v28 = vand.u32 (!%p254_p1), 127, %v330_v24  ;;  %v775_v54 = vld [vmem:[%s1282_s4] ss:$0 sm:$0xff] (!%p254_p1)  ;;  %s289_s26 = sand.u32 (!%p254_p1), 1, %s1019_s30  }
  0x20   : > { %922 = vset.pattern.permute.xlu0 (!%p254_p1), %v1040_v53 }
  0x24   : > { %p328_p3 = scmp.lt.s32.totalorder (!%p254_p1), %s327_s11, 8 }
  0x25   : > { %s1145_s19 = scalar_select %p293_p2, %s1027_s8, 1 }
  0x26   : > { %s1296_s11 = smov (!%p328_p3, %s327_s11), 8  ;;  %s1041_s8 = smov [#allocation4]  }
  0x27   : > { %s785_s20 = sshll.u32 %s1145_s19, 6  ;;  %s784_s24 = sshll.u32 %s1145_s19, 3  ;;  %v332_v30 = vstv %s1296_s11 }
  0x28   : > { %s1154_s23 = scalar_lea.vmem %s1280_s2, %s785_s20  ;;  %s300_s27 = scalar_lea.vmem %s1279_s1, %s784_s24  ;;  %vm333_vm2 = vcmp.lt.s32.totalorder %v331_v28, %v332_v30 }
  0x29   : > { %v923_v1 = vld [vmem:[%s1154_s23] sm:$0xff]   ;;  %v924_v3 = vld [vmem:[%s1154_s23 + $0x8] sm:$0xff]   ;;  %v925_v5 = vld [vmem:[%s1154_s23 + $0x10] sm:$0xff]   ;;  %v764_v31 = vsel %vm333_vm2, 1.0, %v1038_v0  ;;  %s1231_s19 = scalar_lea.hbm %s1285_s7, %s763_s28  ;;  %s653_s20 = scalar_lea.sflag [#allocation5], %s289_s26 }
  0x2a   : > { %v386_v2 = vsel %vm381_vm1, %v923_v1, 0  ;;  %830 = vmatpush3.bf16.msra.mxu1 %v923_v1  ;;  %v389_v4 = vsel %vm381_vm1, %v924_v3, 0  ;;  %v926_v6 = vld [vmem:[%s1154_s23 + $0x18] sm:$0xff]   ;;  %v392_v7 = vsel %vm381_vm1, %v925_v5, 0  ;;  %v927_v8 = vld [vmem:[%s1154_s23 + $0x20] sm:$0xff]   ;;  %v928_v9 = vld [vmem:[%s1154_s23 + $0x28] sm:$0xff]  }
  0x2b   : > { %810 = vmatpush3.bf16.xpose.msra.mxu0 %v386_v2  ;;  %831 = vmatprep.subr.bf16.mxu1 %v1038_v0  ;;  %v395_v10 = vsel %vm381_vm1, %v926_v6, 0  ;;  %v929_v11 = vld [vmem:[%s1154_s23 + $0x30] sm:$0xff]   ;;  %v930_v12 = vld [vmem:[%s1154_s23 + $0x38] sm:$0xff]   ;;  %v398_v13 = vsel %vm381_vm1, %v927_v8, 0  ;;  %v401_v14 = vsel %vm381_vm1, %v928_v9, 0  ;;  %v1191_v17 = vld [vmem:[%s300_s27] sm:$0xff]  }
  0x2c   : > { %811 = vmatprep.subr.bf16.mxu0 %v1038_v0  ;;  %v404_v15 = vsel %vm381_vm1, %v929_v11, 0  ;;  %v407_v16 = vsel %vm381_vm1, %v930_v12, 0  ;;  %v592_v60 = vunpack.c.l.bf16 %v1191_v17  ;;  %v593_v62 = vunpack.c.h.bf16 %v1191_v17  ;;  %s758_s27 = sshll.u32 %s289_s26, 3  ;;  %s959_s22 = sshll.u32 %s1041_s8, 4  ;;  %s960_s22 = int_to_ptr.vmem [resolvable:$false] %s959_s22 }
  0x2d   : > { %s291_s11 = scalar_lea.vmem [#allocation4], %s758_s27  ;;  %s961_s23 = scalar_lea.vmem %s960_s22, 256 }
  0x2e   : > { %832 = vmatpush3.bf16.msra.mxu1 %v924_v3  ;;  %s667_s12 = sshll.u32 %s291_s11, 4  ;;  %s1233_s12 = int_to_ptr.vmem [resolvable:$true] %s667_s12 }
  0x2f   : > { %833 = vmatprep.subr.bf16.mxu1 %v1038_v0  ;;  %s955_s21 = scalar_lea.vmem %s1233_s12, 128  ;;  %p962_p7 = scmp.lt.s32.totalorder %s1233_s12, %s960_s22 }
  0x30   : > { %p956_p4 = scmp.ne.s32.totalorder %s1233_s12, %s955_s21  ;;  %p963_p8 = scmp.lt.s32.totalorder %s961_s23, %s955_s21 }
  0x32   : > { %834 = vmatpush3.bf16.msra.mxu1 %v925_v5  ;;  %v597_v5 = vld [vmem:[%s1283_s5] sm:$0xf]  ;;  %p957_p5 = pnand %p956_p4, %p1125_p9  ;;  %p964_p10 = por %p963_p8, %p962_p7 }
  0x33   : > { %812 = vmatpush3.bf16.xpose.msra.mxu0 %v389_v4  ;;  %835 = vmatprep.subr.bf16.mxu1 %v1038_v0 }
  0x34   : > { %813 = vmatprep.subr.bf16.mxu0 %v1038_v0  ;;  %p958_p6 = pneg %p957_p5 }
  0x36   : > { %836 = vmatpush3.bf16.msra.mxu1 %v926_v6  ;;  %p965_p11 = pnand %p964_p10, %p958_p6 }
  0x37   : > { %837 = vmatprep.subr.bf16.mxu1 %v1038_v0 }
  0x3a   : > { %838 = vmatpush3.bf16.msra.mxu1 %v927_v8 }
  0x3b   : > { %814 = vmatpush3.bf16.xpose.msra.mxu0 %v392_v7  ;;  %839 = vmatprep.subr.bf16.mxu1 %v1038_v0 }
  0x3c   : > { %815 = vmatprep.subr.bf16.mxu0 %v1038_v0 }
  0x3e   : > { %840 = vmatpush3.bf16.msra.mxu1 %v928_v9 }
  0x3f   : > { %841 = vmatprep.subr.bf16.mxu1 %v1038_v0 }
  0x42   : > { %842 = vmatpush3.bf16.msra.mxu1 %v929_v11 }
  0x43   : > { %816 = vmatpush3.bf16.xpose.msra.mxu0 %v395_v10  ;;  %843 = vmatprep.subr.bf16.mxu1 %v1038_v0 }
  0x44   : > { %817 = vmatprep.subr.bf16.mxu0 %v1038_v0 }
  0x46   : > { %844 = vmatpush3.bf16.msra.mxu1 %v930_v12 }
  0x47   : > { %849 = vmatprep.subr.bf16.mxu1 %v1038_v0 }
  0x4b   : > { %818 = vmatpush3.bf16.xpose.msra.mxu0 %v398_v13 }
  0x4c   : > { %819 = vmatprep.subr.bf16.mxu0 %v1038_v0 }
  0x53   : > { %820 = vmatpush3.bf16.xpose.msra.mxu0 %v401_v14 }
  0x54   : > { %821 = vmatprep.subr.bf16.mxu0 %v1038_v0 }
  0x5b   : > { %822 = vmatpush3.bf16.xpose.msra.mxu0 %v404_v15 }
  0x5c   : > { %823 = vmatprep.subr.bf16.mxu0 %v1038_v0 }
  0x63   : > { %824 = vmatpush3.bf16.xpose.msra.mxu0 %v407_v16 }
  0x6a   : > { %826 = vmatmul.mubr.msk.bf16.vlgmr.msra.gmra.mrb[0].mxu0 %vm381_vm1, %v1191_v17 }
 0x13d   : > { %v443_v18 = vpop.f32.mrb[0].mxu0 }
 0x13e   : > { %450 = vmax.xlane.f32.xlu0 %v443_v18  ;;  %v827_v19 = vpop.f32.mrb[1].mxu0 }
 0x13f   : > { %v446_v20 = vpop.f32.mrb[2].mxu0 }
 0x140   : > { %v828_v21 = vpop.f32.mrb[3].mxu0 }
 0x142   : > { %452 = vmax.xlane.f32.xlu0 %v446_v20 }
 0x158   : > { %601 = vperm.xlu0 %922, %v598_v52  }
 0x1cb   : > { %v451_v22 = vpop.xlane.xlu0 %450 }
 0x1cc   : > { %v454_v23 = vsub.f32 %v443_v18, %v451_v22 }
 0x1ce   : > { %v456_v25 = vmul.f32 1.442695, %v454_v23 }
 0x1cf   : > { %v453_v26 = vpop.xlane.xlu0 %452 }
 0x1d0   : > { %935 = vpow2.f32 %v456_v25  ;;  %v455_v27 = vsub.f32 %v446_v20, %v453_v26 }
 0x1d2   : > { %v458_v29 = vmul.f32 1.442695, %v455_v27 }
 0x1d4   : > { %937 = vpow2.f32 %v458_v29 }
 0x1d7   : > { %v602_v6 = vpop.permute.xlu0 %601 }
 0x1da   : > { %v936_v32 = vpop.eup %935 }
 0x1db   : > { %v460_v33 = vmul.f32 %v936_v32, %v764_v31 }
 0x1dd   : > { %462 = vadd.xlane.f32.xlu1 %v460_v33 }
 0x1de   : > { %v938_v34 = vpop.eup %937 }
 0x1df   : > { %v461_v35 = vmul.f32 %v938_v34, %v764_v31 }
 0x1e1   : > { %464 = vadd.xlane.f32.xlu1 %v461_v35 }
 0x26a   : > { %v463_v36 = vpop.xlane.xlu1 %462 }
 0x26b   : > { %v466_v37 = vadd.f32 1e-13, %v463_v36 }
 0x26d   : > { %939 = vrcp.f32 %v466_v37 }
 0x26e   : > { %v465_v38 = vpop.xlane.xlu1 %464 }
 0x26f   : > { %v467_v39 = vadd.f32 1e-13, %v465_v38 }
 0x271   : > { %941 = vrcp.f32 %v467_v39 }
 0x277   : > { %v940_v40 = vpop.eup %939 }
 0x278   : > { %v470_v42 = vmul.f32 %v940_v40, %v460_v33 }
 0x27b   : > { %v942_v41 = vpop.eup %941 }
 0x27c   : > { %v471_v43 = vmul.f32 %v942_v41, %v461_v35 }
 0x27e   : > { %v472_v45 = vpack.c.bf16 %v471_v43, %v470_v42 }
 0x280   : > { %846 = vmatmul.mubr.bf16.vlgmr.msra.gmra.mrb[0].mxu1 %v472_v45 }
 0x281   : > { %850 = vmatpush3.bf16.msra.mxu1 %v932_v44  ;;  %853 = vmatprep.mubr.msk.bf16.mxu1 %vm1039_vm0, %v1038_v0 }
 0x282   : > { %851 = vmatprep.subr.bf16.mxu1 %v1038_v0 }
 0x285   : > { %852 = vmatpush3.bf16.msra.mxu1 %v933_v46 }
 0x286   : > { %857 = vmatprep.subr.bf16.mxu1 %v1038_v0 }
 0x353   : > { %v515_v47 = vpop.f32.mrb[0].mxu1 }
 0x354   : > { %v847_v48 = vpop.f32.mrb[1].mxu1 }
 0x355   : > { %v518_v49 = vpop.f32.mrb[2].mxu1 }
 0x356   : > { %v522_v50 = vpack.c.bf16 %v518_v49, %v515_v47  ;;  %v848_v51 = vpop.f32.mrb[3].mxu1 }
 0x358   : > { %854 = vmatmul.mubr.msk.bf16.vlgmr.msra.gmra.mrb[4].mxu1 %vm381_vm1, %v522_v50 }
 0x359   : > { %859 = vmatprep.mubr.msk.bf16.mxu1 %vm1039_vm0, %v1038_v0 }
 0x42b   : > { %v583_v55 = vpop.f32.mrb[4].mxu1 }
 0x42c   : > { %v584_v56 = vadd.f32 %v775_v54, %v583_v55  ;;  %v855_v57 = vpop.f32.mrb[5].mxu1 }
 0x42d   : > { %v586_v58 = vpop.f32.mrb[6].mxu1 }
 0x42e   : > { %v590_v59 = vmax.f32 %v584_v56, 0.0  ;;  %v587_v61 = vadd.f32 %v775_v54, %v586_v58  ;;  %v856_v63 = vpop.f32.mrb[7].mxu1 }
 0x430   : > { %v591_v0 = vmax.f32 %v587_v61, 0.0  ;;  %v594_v1 = vadd.f32 %v592_v60, %v590_v59 }
 0x432   : > { %v595_v2 = vadd.f32 %v593_v62, %v591_v0 }
 0x434   : > { %v596_v3 = vpack.c.bf16 %v595_v2, %v594_v1 }
 0x436   : > { %v608_v4 = vsel %vm381_vm1, %v596_v3, 0 }
 0x437   : > { %858 = vmatpush3.bf16.xpose.msra.mxu1 %v608_v4 }
 0x43e   : > { %860 = vmatmul.mubr.msk.bf16.vlgmr.msra.gmra.mrb[8].mxu1 %vm381_vm1, %v597_v5 }
 0x511   : > { %v644_v7 = vpop.f32.mrb[8].mxu1 }
 0x512   : > { %v861_v8 = vpop.f32.mrb[9].mxu1  ;;  %v645_v9 = vadd.f32 %v644_v7, %v602_v6 }
 0x513   : > { %v647_v10 = vpop.f32.mrb[10].mxu1 }
 0x514   : > { %v862_v11 = vpop.f32.mrb[11].mxu1  ;;  %651 = vst.msk [vmem:[%s291_s11] sm:$0xff] %vm650_vm3, %v645_v9 }
 0x515   : > { %968 = shalt.err (!%p965_p11)
}
 0x516   : > { %s969_s28 = scalar_lea.hbm %s1231_s19, 128  ;;  %s973_s26 = scalar_lea.hbm %s1285_s7, 256 }
 0x517   : > { %p970_p12 = scmp.ne.s32.totalorder %s1231_s19, %s969_s28  ;;  %p974_p2 = scmp.lt.u32.totalorder %s1231_s19, %s1285_s7 }
 0x518   : > { %p975_p3 = scmp.lt.u32.totalorder %s973_s26, %s969_s28  ;;  %p977_p5 = scmp.lt.u32.totalorder %s969_s28, %s1231_s19 }
 0x519   : > { %p971_p0 = pnand %p970_p12, %p1125_p9 }
 0x51a   : > { %p976_p4 = por %p975_p3, %p974_p2 }
 0x51b   : > { %p972_p1 = pneg %p971_p0 }
 0x51c   : > { %p978_p6 = por %p977_p5, %p976_p4 }
 0x51e   : > { %p979_p7 = pnand %p978_p6, %p972_p1 }
 0x520   : > { %982 = shalt.err (!%p979_p7)
}
 0x521   : > { %863 = dma.vmem_to_hbm [thread:$0]  (%p1125_p9), %s1233_s12, 128, %s1231_s19, %s653_s20  }
 0x522 PF: > { %p869_p8 = scmp.ge.s32.totalorder %s1035_s10, 2  ;;  %s679_s14 = sand.u32 1, %s1015_s29  }
 0x523   : > { %s680_s16 = scalar_lea.sflag [#allocation5], %s679_s14 }
 0x524   : > { %p866_p10 = pnand %p869_p8, %p1132_p13 }
 0x526   : > { %1010 = dma.done.wait (!%p866_p10), %s680_s16, 128  }
 0x527   : > { %1012 = vsyncadd (!%p866_p10), %s680_s16, 4294967168  ;;  %s26_s10 = sadd.s32 1, %s1035_s10   ;;  %s1288_s29 = smov %s1019_s30 }
 0x528   : > { %p23_p11 = scmp.ge.s32.totalorder %s26_s10, 4   ;;  %s1289_s30 = smov %s1023_s0 }
 0x529   : > { %s1290_s0 = smov %s1138_s18  ;;  %s1291_s8 = smov %s1031_s9 }
 0x52a   : > { %s1292_s9 = smov %s1294_s13  ;;  %25 = sbr.rel (!%p23_p11) target bundleno = 19 (0x13), region = 82 }
 0x531   :  { %685 = vsyncpa [#allocation5], 1 }
 0x532   :  { %687 = vsyncpa [#allocation5 + $0x1], 1 }

</bundles_post_ra>
